<compile_context>
chip_gen: v5e
topology: v5e:2x2
jax: 0.10.0
libtpu: 0.0.40
codegen_flags: <defaults>
</compile_context>

<pallas_src>
import numpy as np
import jax
import jax.numpy as jnp
from jax.experimental import pallas as pl
from jax.experimental.pallas import tpu as pltpu

# ---------------- compile-time "parameters" (FIR bandpass taps) --------------
K = 31            # number of FIR taps (odd -> 'same' convolution)
FS = 500.0        # sampling rate, matches bandpass={"fs": 500}
LOWCUT, HIGHCUT = 0.5, 45.0


def fir_bandpass_taps(num_taps: int, fs: float, low: float, high: float) -> np.ndarray:
    """Deterministic Hamming-windowed-sinc bandpass FIR taps (host / numpy)."""
    n = np.arange(num_taps, dtype=np.float64) - (num_taps - 1) / 2.0

    def sinc_lowpass(fc):
        return (2.0 * fc / fs) * np.sinc(2.0 * fc / fs * n)

    h = sinc_lowpass(high) - sinc_lowpass(low)
    win = 0.54 - 0.46 * np.cos(
        2.0 * np.pi * np.arange(num_taps, dtype=np.float64) / (num_taps - 1)
    )
    return (h * win).astype(np.float32)


def conv_matrix(taps: np.ndarray, T: int, dtype) -> jnp.ndarray:
    """(T, T) banded matrix W s.t. (x @ W)[t] == 'same' FIR conv of x at t.

    y[t] = sum_i x[i] * taps[i - t + pad]   (zero padding outside [0, T)).
    """
    k = taps.shape[0]
    pad = (k - 1) // 2
    i = np.arange(T)[:, None]            # input sample index  (rows of W)
    j = np.arange(T)[None, :]            # output sample index (cols of W)
    tap_idx = i - j + pad
    valid = (tap_idx >= 0) & (tap_idx < k)
    w = np.where(valid, taps[np.clip(tap_idx, 0, k - 1)], 0.0).astype(np.float32)
    return jnp.asarray(w, dtype=dtype)


def _round_up(a: int, b: int) -> int:
    return -(-a // b) * b


# ------------------------------- Pallas kernel -------------------------------
def preproc_kernel(x_ref, w_ref, o_ref):
    """One row-tile per grid step.

    x_ref : VMEM (Mb, T)  f32   rows = flattened (batch, lead)
    w_ref : VMEM (T,  T)  bf16  banded FIR conv matrix (same block every step)
    o_ref : VMEM (Mb, T)  f32   preprocessed output block
    """
    # --- BandPass: FIR 'same' conv as a single MXU matmul (f32 accumulation) --
    y = jnp.dot(
        x_ref[...].astype(jnp.bfloat16),
        w_ref[...],
        preferred_element_type=jnp.float32,
    )

    # --- Normalize(method="min-max"): per-(batch, lead) scaling to [0, 1] -----
    mn = jnp.min(y, axis=-1, keepdims=True)
    mx = jnp.max(y, axis=-1, keepdims=True)
    inv = pl.reciprocal(mx - mn + 1e-8, approx=True)   # EUP; eps guards mx==mn
    o_ref[...] = ((y - mn) * inv).astype(o_ref.dtype)


# --------------------------------- wrapper -----------------------------------
def preproc_manager_forward(sig: jnp.ndarray, *, block_rows: int = 256) -> jnp.ndarray:
    """Equivalent of PreprocManager.forward for [BandPass, Normalize(min-max)]."""
    B, C, T = sig.shape
    M = B * C
    x = sig.reshape(M, T)

    taps = fir_bandpass_taps(K, FS, LOWCUT, HIGHCUT)
    w = conv_matrix(taps, T, jnp.bfloat16)

    # Row tiling: multiple of 8 sublanes; aim for >=2 grid steps (v7x megacore)
    # while keeping blocks large enough to amortize per-step overhead.
    Mb = min(block_rows, max(8, _round_up(-(-M // 2), 8)))
    grid_m = pl.cdiv(M, Mb)
    Mp = grid_m * Mb
    if Mp != M:
        # padded rows are all-zero -> y == 0 -> output 0 (eps avoids NaN); sliced off below.
        x = jnp.pad(x, ((0, Mp - M), (0, 0)))

    out = pl.pallas_call(
        preproc_kernel,
        out_shape=jax.ShapeDtypeStruct((Mp, T), sig.dtype),
        grid_spec=pltpu.PrefetchScalarGridSpec(
            num_scalar_prefetch=0,
            grid=(grid_m,),
            in_specs=[
                pl.BlockSpec((Mb, T), lambda i: (i, 0)),   # signal rows
                pl.BlockSpec((T, T), lambda i: (0, 0)),    # conv matrix (fetched once)
            ],
            out_specs=pl.BlockSpec((Mb, T), lambda i: (i, 0)),
        ),
        compiler_params=pltpu.CompilerParams(
            dimension_semantics=("parallel",),
        ),
    )(x, w)

    return out[:M].reshape(B, C, T)


# ----------------------------------- main ------------------------------------
if __name__ == "__main__":
    key = jax.random.PRNGKey(0)
    batch, n_leads, siglen = 2, 12, 256          # small (N, C, L) ECG-like signal
    sig = jax.random.normal(key, (batch, n_leads, siglen), dtype=jnp.float32)

    out = preproc_manager_forward(sig)
    out = jax.block_until_ready(out)

    assert out.shape == (batch, n_leads, siglen)
    assert out.dtype == sig.dtype
    assert bool(jnp.all(jnp.isfinite(out)))
    print("KERNEL_OK")
</pallas_src>

<mosaic_0001>
module attributes {stable_mosaic.version = 11 : i64} {
  func.func @preproc_kernel(%arg0: i32, %arg1: memref<16x256xf32, #tpu.memory_space<vmem>>, %arg2: memref<256x256xbf16, #tpu.memory_space<vmem>>, %arg3: memref<16x256xf32, #tpu.memory_space<vmem>>) attributes {dimension_semantics = [#tpu.dimension_semantics<parallel>], iteration_bounds = array<i64: 2>, scalar_prefetch = 0 : i64, scratch_operands = 0 : i64, tpu.core_type = #tpu.core_type<tc>, window_params = [{transform_indices = @transform_0, window_bounds = array<i64: 16, 256>}, {pipeline_mode = #tpu.pipeline_mode<synchronous>, transform_indices = @transform_1, window_bounds = array<i64: 256, 256>}, {transform_indices = @transform_2, window_bounds = array<i64: 16, 256>}]} {
    %c0 = arith.constant 0 : index
    %c0_0 = arith.constant 0 : index
    %0 = vector.load %arg1[%c0, %c0_0] : memref<16x256xf32, #tpu.memory_space<vmem>>, vector<16x256xf32>
    %1 = arith.truncf %0 : vector<16x256xf32> to vector<16x256xbf16>
    %c0_1 = arith.constant 0 : index
    %c0_2 = arith.constant 0 : index
    %2 = vector.load %arg2[%c0_1, %c0_2] : memref<256x256xbf16, #tpu.memory_space<vmem>>, vector<256x256xbf16>
    %cst = arith.constant dense<0.000000e+00> : vector<16x256xf32>
    %3 = tpu.matmul %1, %2, %cst {dimension_numbers = #tpu.dot_dimension_numbers<[1], [0], [0], [1], [0, 0, 1, 1], [], []>} : vector<16x256xbf16>, vector<256x256xbf16>, vector<16x256xf32> -> vector<16x256xf32>
    %cst_3 = arith.constant dense<0x7F800000> : vector<16xf32>
    %4 = vector.multi_reduction <minimumf>, %3, %cst_3 [1] : vector<16x256xf32> to vector<16xf32>
    %5 = vector.shape_cast %4 : vector<16xf32> to vector<16x1xf32>
    %cst_4 = arith.constant dense<0xFF800000> : vector<16xf32>
    %6 = vector.multi_reduction <maximumf>, %3, %cst_4 [1] : vector<16x256xf32> to vector<16xf32>
    %7 = vector.shape_cast %6 : vector<16xf32> to vector<16x1xf32>
    %8 = arith.subf %7, %5 : vector<16x1xf32>
    %cst_5 = arith.constant 9.99999993E-9 : f32
    %9 = vector.broadcast %cst_5 : f32 to vector<16x1xf32>
    %10 = arith.addf %8, %9 : vector<16x1xf32>
    %11 = tpu.reciprocal %10 {approx = true} : vector<16x1xf32> -> vector<16x1xf32>
    %12 = vector.broadcast %5 : vector<16x1xf32> to vector<16x256xf32>
    %13 = arith.subf %3, %12 : vector<16x256xf32>
    %14 = vector.broadcast %11 : vector<16x1xf32> to vector<16x256xf32>
    %15 = arith.mulf %13, %14 : vector<16x256xf32>
    %c0_6 = arith.constant 0 : index
    %c0_7 = arith.constant 0 : index
    %16 = vector.load %arg3[%c0_6, %c0_7] : memref<16x256xf32, #tpu.memory_space<vmem>>, vector<16x256xf32>
    tpu.vector_store %arg3[%c0_6, %c0_7], %15 {strides = array<i32>} : memref<16x256xf32, #tpu.memory_space<vmem>>, vector<16x256xf32>,
    return
  }
  func.func @transform_0(%arg0: i32) -> (i32, i32) {
    %c0_i32 = arith.constant 0 : i32
    %c0_i32_0 = arith.constant 0 : i32
    return %arg0, %c0_i32 : i32, i32
  }
  func.func @transform_1(%arg0: i32) -> (i32, i32) {
    %c0_i32 = arith.constant 0 : i32
    %c0_i32_0 = arith.constant 0 : i32
    %c0_i32_1 = arith.constant 0 : i32
    return %c0_i32, %c0_i32_0 : i32, i32
  }
  func.func @transform_2(%arg0: i32) -> (i32, i32) {
    %c0_i32 = arith.constant 0 : i32
    %c0_i32_0 = arith.constant 0 : i32
    return %arg0, %c0_i32 : i32, i32
  }
}

</mosaic_0001>

<bundles_post_ra>
// kernel: tpu_custom_call.1
= control target key start
LH: loop header
LB: loop body
LE: loop exit
PB: predicated region body
PF: predicated region fallthrough
CT: control target
= control target key end

     0   :  { %7 = vsyncpa [#allocation3], 0  ;;  %s1121_s0 = inlined_call_operand.hbm [shape: f32[32,256], index: 0, kind: input, shape index: {}]   ;;  %s1122_s1 = inlined_call_operand.hbm [shape: bf16[256,256], index: 1, kind: input, shape index: {}]   ;;  %s1123_s2 = inlined_call_operand.hbm [shape: f32[32,256], index: 2, kind: output, shape index: {}]  }
   0x1   :  { %9 = vsyncpa [#allocation3 + $0x1], 0 }
   0x2   :  { %10 = vsyncpa [#allocation6], 0 }
   0x3   :  { %11 = vsyncpa [#allocation4], 0 }
   0x4   :  { %13 = vsyncpa [#allocation4 + $0x1], 0  ;;  %s971_s9 = smov 0   ;;  %s973_s10 = smov 0  }
   0x5   :  { %s975_s11 = smov 0   ;;  %s977_s12 = smov 0  }
   0x6 LB: > { %s992_s13 = sadd.s32 4294967295, %s947_s12   ;;  %s568_s14 = sadd.s32 4294967294, %s947_s12   ;;  %s947_s12 = sphi %s977_s12, %s1133_s12   ;;  %s943_s11 = sphi %s975_s11, %s1132_s11   ;;  %s939_s10 = sphi %s973_s10, %s1131_s10   ;;  %s935_s9 = sphi %s971_s9, %s1130_s9  }
   0x7   : > { %p39_p0 = scmp.ne.s32.totalorder %s939_s10, %s935_s9  ;;  %p40_p1 = scmp.eq.s32.totalorder %s992_s13, 0 }
   0x8   : > { %p84_p2 = scmp.eq.s32.totalorder %s992_s13, 1  ;;  %p90_p3 = scmp.eq.s32.totalorder %s568_s14, 1 }
   0x9   : > { %p1001_p4 = por %p40_p1, %p39_p0  ;;  %p569_p5 = scmp.ge.s32.totalorder %s947_s12, 1 }
   0xa   : > { %p1006_p6 = por %p90_p3, %p39_p0  ;;  %p97_p7 = scmp.lt.s32.totalorder %s947_s12, 3 }
   0xb   : > { %s108_s19 = sshll.u32 %s1122_s1, 4  ;;  %s949_s21 = smov [#allocation5]   ;;  %s109_s19 = int_to_ptr.hbm [resolvable:$true] %s108_s19 }
   0xc   : > { %p1014_p8 = pnand %p569_p5, %p97_p7  ;;  %s110_s22 = sshll.u32 %s949_s21, 4  ;;  %s111_s22 = int_to_ptr.vmem [resolvable:$true] %s110_s22 }
   0xd   : > { %s1024_s23 = sadd.s32 1, %s947_s12   ;;  %s950_s24 = smov 128  }
   0xe   : > { %p758_p9 = pneg %p1014_p8  ;;  %s951_s25 = smov 8  }
   0xf   : > { %s23_s26 = ssub.s32 %s947_s12, %s1024_s23  ;;  %s26_s27 = sadd.s32 1, %s943_s11 }
  0x10   : > { %p759_p10 = pnand %p758_p9, %p40_p1  ;;  %p24_p12 = scmp.eq.s32.totalorder %s23_s26, 0 }
  0x11   : > { %p33_p13 = scmp.ne.s32.totalorder %s943_s11, %s939_s10  ;;  %p34_p0 = scmp.eq.s32.totalorder %s947_s12, 0 }
  0x12   : > { %761 = dma.hbm_to_vmem [thread:$0]  (!%p759_p10), %s109_s19, 4096, %s111_s22, [#allocation6], %s950_s24, %s950_s24, %s951_s25  }
  0x13   : > { %p771_p3 = scmp.lt.s32.totalorder %s947_s12, 2  ;;  %p35_p5 = por %p34_p0, %p33_p13 }
  0x14   : > { %s1034_s28 = scalar_select %p24_p12, %s943_s11, %s26_s27  }
  0x15   : > { %p1038_p7 = por %p84_p2, %p33_p13  ;;  %s124_s30 = sand.u32 1, %s943_s11  }
  0x16   : > { %s715_s3 = sshll.u32 %s947_s12, 5  ;;  %s572_s4 = sshll.u32 %s124_s30, 5 }
  0x17   : > { %s134_s7 = scalar_lea.hbm %s1121_s0, %s715_s3  ;;  %s128_s14 = scalar_lea.vmem [#allocation2], %s572_s4 }
  0x18   : > { %s135_s8 = sshll.u32 %s134_s7, 4  ;;  %s137_s17 = sshll.u32 %s128_s14, 4  ;;  %s136_s8 = int_to_ptr.hbm [resolvable:$true] %s135_s8  ;;  %s138_s17 = int_to_ptr.vmem [resolvable:$true] %s137_s17 }
  0x19   : > { %p1049_p9 = pnand %p771_p3, %p35_p5  ;;  %s125_s19 = scalar_lea.sflag [#allocation3], %s124_s30 }
  0x1a   : > { %s847_s21 = sshra.s32 %s136_s8, 4  ;;  %s854_s26 = scalar_lea.hbm %s1121_s0, 64  ;;  %s848_s21 = int_to_ptr.hbm [resolvable:$true] %s847_s21 }
  0x1b   : > { %s849_s22 = scalar_lea.hbm %s848_s21, 32  ;;  %p851_p10 = pneg %p1049_p9 }
  0x1c   : > { %p850_p2 = scmp.ne.s32.totalorder %s848_s21, %s849_s22  ;;  %p855_p0 = scmp.lt.s32.totalorder %s848_s21, %s1121_s0 }
  0x1d   : > { %p856_p3 = scmp.lt.s32.totalorder %s854_s26, %s849_s22 }
  0x1e   : > { %p852_p12 = pnand %p851_p10, %p850_p2 }
  0x1f   : > { %p857_p5 = por %p856_p3, %p855_p0 }
  0x20   : > { %p853_p13 = pneg %p852_p12 }
  0x22   : > { %p858_p11 = pnand %p857_p5, %p853_p13 }
  0x24   : > { %861 = shalt.err (!%p858_p11)
}
  0x25   : > { %s952_s30 = smov 256   ;;  %s953_s4 = smov 16  }
  0x26   : > { %765 = dma.hbm_to_vmem [thread:$0]  (!%p1049_p9), %s136_s8, 512, %s138_s17, %s125_s19, %s952_s30, %s952_s30, %s953_s4  }
  0x27   : > { %149 = sbr.rel (%p1014_p8) target bundleno = 362 (0x16a), region = 28  ;;  %s1066_s5 = sand.u32 (!%p1014_p8), 1, %s939_s10  }
  0x28   : > { %s577_s6 = sshll.u32 (!%p1014_p8), %s1066_s5, 5  ;;  %s152_s7 = scalar_lea.sflag (!%p1014_p8), [#allocation3], %s1066_s5 }
  0x29   : > { %s1072_s14 = scalar_lea.vmem (!%p1014_p8), [#allocation2], %s577_s6 }
  0x2c   : > { %922 = dma.done.wait (%p1001_p4), %s152_s7, 512  }
  0x2d   : > { %924 = vsyncadd (%p1001_p4), %s152_s7, 4294966784 }
  0x2e   : > { %926 = dma.done.wait (%p40_p1), [#allocation6], 4096  }
  0x2f   : > { %928 = vsyncadd (%p40_p1), [#allocation6], 4294963200  ;;  %v638_v0 = vld [vmem:[#allocation5 + $0x70] sm:$0xf]  ;;  %v731_v1 = vld [vmem:[#allocation5 + $0x74] sm:$0xf0] }
  0x30   : > { %v702_v2 = vld [vmem:[#allocation5 + $0xf0] sm:$0xf]  ;;  %v639_v3 = vor.u32 %v731_v1, %v638_v0  ;;  %v747_v4 = vld [vmem:[#allocation5 + $0xf4] sm:$0xf0]  ;;  %v730_v5 = vld [vmem:[#allocation5 + $0x74] sm:$0xf] }
  0x31   : > { %v640_v6 = vld [vmem:[#allocation5 + $0x78] sm:$0xf0]  ;;  %v703_v7 = vor.u32 %v747_v4, %v702_v2  ;;  %v746_v9 = vld [vmem:[#allocation5 + $0xf4] sm:$0xf]  ;;  %v630_v11 = vld [vmem:[#allocation5 + $0x60] sm:$0xf] }
  0x32   : > { %v643_v8 = vor.u32 %v730_v5, %v640_v6  ;;  %v704_v10 = vld [vmem:[#allocation5 + $0xf8] sm:$0xf0]  ;;  %382 = vmatpush.bf16.msra.mxu0 %v639_v3  ;;  %v729_v13 = vld [vmem:[#allocation5 + $0x64] sm:$0xf0]  ;;  %v694_v14 = vld [vmem:[#allocation5 + $0xe0] sm:$0xf] }
  0x33   : > { %v707_v12 = vor.u32 %v746_v9, %v704_v10  ;;  %v745_v15 = vld [vmem:[#allocation5 + $0xe4] sm:$0xf0]  ;;  %396 = vmatpush.bf16.msra.mxu1 %v703_v7  ;;  %v631_v16 = vor.u32 %v729_v13, %v630_v11  ;;  %v728_v18 = vld [vmem:[#allocation5 + $0x64] sm:$0xf]  ;;  %v632_v19 = vld [vmem:[#allocation5 + $0x68] sm:$0xf0] }
  0x34   : > { %410 = vmatpush.bf16.msra.mxu2 %v643_v8  ;;  %v695_v17 = vor.u32 %v745_v15, %v694_v14  ;;  %v744_v20 = vld [vmem:[#allocation5 + $0xe4] sm:$0xf]  ;;  %v635_v21 = vor.u32 %v728_v18, %v632_v19  ;;  %v696_v22 = vld [vmem:[#allocation5 + $0xe8] sm:$0xf0]  ;;  %v622_v23 = vld [vmem:[#allocation5 + $0x50] sm:$0xf] }
  0x35   : > { %424 = vmatpush.bf16.msra.mxu3 %v707_v12  ;;  %v727_v24 = vld [vmem:[#allocation5 + $0x54] sm:$0xf0]  ;;  %v699_v25 = vor.u32 %v744_v20, %v696_v22  ;;  %v686_v26 = vld [vmem:[#allocation5 + $0xd0] sm:$0xf]  ;;  %v726_v28 = vld [vmem:[#allocation5 + $0x54] sm:$0xf] }
  0x36   : > { %v743_v27 = vld [vmem:[#allocation5 + $0xd4] sm:$0xf0]  ;;  %383 = vmatpush.bf16.msra.mxu0 %v631_v16  ;;  %v623_v29 = vor.u32 %v727_v24, %v622_v23  ;;  %v624_v30 = vld [vmem:[#allocation5 + $0x58] sm:$0xf0]  ;;  %v742_v31 = vld [vmem:[#allocation5 + $0xd4] sm:$0xf] }
  0x37   : > { %v688_v32 = vld [vmem:[#allocation5 + $0xd8] sm:$0xf0]  ;;  %397 = vmatpush.bf16.msra.mxu1 %v695_v17  ;;  %v687_v33 = vor.u32 %v743_v27, %v686_v26  ;;  %v627_v34 = vor.u32 %v726_v28, %v624_v30  ;;  %v614_v35 = vld [vmem:[#allocation5 + $0x40] sm:$0xf]  ;;  %v725_v36 = vld [vmem:[#allocation5 + $0x44] sm:$0xf0] }
  0x38   : > { %411 = vmatpush.bf16.msra.mxu2 %v635_v21  ;;  %v678_v37 = vld [vmem:[#allocation5 + $0xc0] sm:$0xf]  ;;  %v691_v38 = vor.u32 %v742_v31, %v688_v32  ;;  %v741_v39 = vld [vmem:[#allocation5 + $0xc4] sm:$0xf0]  ;;  %v724_v40 = vld [vmem:[#allocation5 + $0x44] sm:$0xf]  ;;  %v615_v44 = vor.u32 %v725_v36, %v614_v35 }
  0x39   : > { %425 = vmatpush.bf16.msra.mxu3 %v699_v25  ;;  %v616_v41 = vld [vmem:[#allocation5 + $0x48] sm:$0xf0]  ;;  %v740_v42 = vld [vmem:[#allocation5 + $0xc4] sm:$0xf]  ;;  %v679_v45 = vor.u32 %v741_v39, %v678_v37  ;;  %v606_v47 = vld [vmem:[#allocation5 + $0x30] sm:$0xf] }
  0x3a   : > { %v680_v43 = vld [vmem:[#allocation5 + $0xc8] sm:$0xf0]  ;;  %384 = vmatpush.bf16.msra.mxu0 %v623_v29  ;;  %v619_v46 = vor.u32 %v724_v40, %v616_v41  ;;  %v723_v48 = vld [vmem:[#allocation5 + $0x34] sm:$0xf0]  ;;  %v670_v49 = vld [vmem:[#allocation5 + $0xb0] sm:$0xf] }
  0x3b   : > { %398 = vmatpush.bf16.msra.mxu1 %v687_v33  ;;  %v683_v50 = vor.u32 %v740_v42, %v680_v43  ;;  %v739_v51 = vld [vmem:[#allocation5 + $0xb4] sm:$0xf0]  ;;  %v722_v52 = vld [vmem:[#allocation5 + $0x34] sm:$0xf]  ;;  %v608_v53 = vld [vmem:[#allocation5 + $0x38] sm:$0xf0]  ;;  %v607_v56 = vor.u32 %v723_v48, %v606_v47 }
  0x3c   : > { %412 = vmatpush.bf16.msra.mxu2 %v627_v34  ;;  %v738_v54 = vld [vmem:[#allocation5 + $0xb4] sm:$0xf]  ;;  %v672_v55 = vld [vmem:[#allocation5 + $0xb8] sm:$0xf0]  ;;  %v671_v57 = vor.u32 %v739_v51, %v670_v49  ;;  %v611_v58 = vor.u32 %v722_v52, %v608_v53  ;;  %v598_v59 = vld [vmem:[#allocation5 + $0x20] sm:$0xf] }
  0x3d   : > { %426 = vmatpush.bf16.msra.mxu3 %v691_v38  ;;  %v721_v60 = vld [vmem:[#allocation5 + $0x24] sm:$0xf0]  ;;  %v662_v61 = vld [vmem:[#allocation5 + $0xa0] sm:$0xf]  ;;  %v675_v62 = vor.u32 %v738_v54, %v672_v55  ;;  %v720_v0 = vld [vmem:[#allocation5 + $0x24] sm:$0xf] }
  0x3e   : > { %385 = vmatpush.bf16.msra.mxu0 %v615_v44  ;;  %v737_v63 = vld [vmem:[#allocation5 + $0xa4] sm:$0xf0]  ;;  %v600_v1 = vld [vmem:[#allocation5 + $0x28] sm:$0xf0]  ;;  %v736_v2 = vld [vmem:[#allocation5 + $0xa4] sm:$0xf]  ;;  %v599_v4 = vor.u32 %v721_v60, %v598_v59 }
  0x3f   : > { %399 = vmatpush.bf16.msra.mxu1 %v679_v45  ;;  %v664_v3 = vld [vmem:[#allocation5 + $0xa8] sm:$0xf0]  ;;  %v663_v5 = vor.u32 %v737_v63, %v662_v61  ;;  %v603_v6 = vor.u32 %v720_v0, %v600_v1  ;;  %v590_v7 = vld [vmem:[#allocation5 + $0x10] sm:$0xf]  ;;  %v719_v8 = vld [vmem:[#allocation5 + $0x14] sm:$0xf0] }
  0x40   : > { %413 = vmatpush.bf16.msra.mxu2 %v619_v46  ;;  %v654_v9 = vld [vmem:[#allocation5 + $0x90] sm:$0xf]  ;;  %v667_v10 = vor.u32 %v736_v2, %v664_v3  ;;  %v735_v11 = vld [vmem:[#allocation5 + $0x94] sm:$0xf0]  ;;  %v718_v12 = vld [vmem:[#allocation5 + $0x14] sm:$0xf]  ;;  %v591_v16 = vor.u32 %v719_v8, %v590_v7 }
  0x41   : > { %427 = vmatpush.bf16.msra.mxu3 %v683_v50  ;;  %v592_v13 = vld [vmem:[#allocation5 + $0x18] sm:$0xf0]  ;;  %v734_v14 = vld [vmem:[#allocation5 + $0x94] sm:$0xf]  ;;  %v655_v17 = vor.u32 %v735_v11, %v654_v9  ;;  %v582_v19 = vld [vmem:[#allocation5] sm:$0xf] }
  0x42   : > { %386 = vmatpush.bf16.msra.mxu0 %v607_v56  ;;  %v656_v15 = vld [vmem:[#allocation5 + $0x98] sm:$0xf0]  ;;  %v595_v18 = vor.u32 %v718_v12, %v592_v13  ;;  %v717_v20 = vld [vmem:[#allocation5 + $0x4] sm:$0xf0]  ;;  %v646_v21 = vld [vmem:[#allocation5 + $0x80] sm:$0xf] }
  0x43   : > { %400 = vmatpush.bf16.msra.mxu1 %v671_v57  ;;  %v659_v22 = vor.u32 %v734_v14, %v656_v15  ;;  %v733_v23 = vld [vmem:[#allocation5 + $0x84] sm:$0xf0]  ;;  %v716_v24 = vld [vmem:[#allocation5 + $0x4] sm:$0xf]  ;;  %v584_v25 = vld [vmem:[#allocation5 + $0x8] sm:$0xf0]  ;;  %v583_v28 = vor.u32 %v717_v20, %v582_v19 }
  0x44   : > { %414 = vmatpush.bf16.msra.mxu2 %v611_v58  ;;  %v732_v26 = vld [vmem:[#allocation5 + $0x84] sm:$0xf]  ;;  %v648_v27 = vld [vmem:[#allocation5 + $0x88] sm:$0xf0]  ;;  %v186_v30 = vld [vmem:[%s1072_s14 + $0x10] sm:$0xff]  ;;  %v647_v31 = vor.u32 %v733_v23, %v646_v21  ;;  %v587_v32 = vor.u32 %v716_v24, %v584_v25  ;;  %s749_s15 = sshll.u32 %s992_s13, 5 }
  0x45   : > { %428 = vmatpush.bf16.msra.mxu3 %v675_v62  ;;  %v184_v29 = vld [vmem:[%s1072_s14] sm:$0xff]  ;;  %v185_v33 = vld [vmem:[%s1072_s14 + $0x8] sm:$0xff]  ;;  %v187_v34 = vld [vmem:[%s1072_s14 + $0x18] sm:$0xff]  ;;  %v651_v35 = vor.u32 %v732_v26, %v648_v27  ;;  %s181_s20 = scalar_lea.vmem [#allocation7], %s577_s6  ;;  %s481_s18 = scalar_lea.hbm %s1123_s2, %s749_s15 }
  0x46   : > { %387 = vmatpush.bf16.msra.mxu0 %v599_v4  ;;  %v188_v36 = vpack.c.bf16 %v186_v30, %v184_v29  ;;  %v189_v37 = vpack.c.bf16 %v187_v34, %v185_v33  ;;  %s482_s19 = sshll.u32 %s181_s20, 4  ;;  %s484_s21 = sshll.u32 %s481_s18, 4  ;;  %s483_s19 = int_to_ptr.vmem [resolvable:$true] %s482_s19  ;;  %s485_s21 = int_to_ptr.hbm [resolvable:$true] %s484_s21 }
  0x47   : > { %401 = vmatpush.bf16.msra.mxu1 %v663_v5  ;;  %s469_s13 = scalar_lea.sflag [#allocation4], %s1066_s5  ;;  %s891_s22 = sshra.s32 %s485_s21, 4  ;;  %s892_s22 = int_to_ptr.hbm [resolvable:$true] %s891_s22 }
  0x48   : > { %415 = vmatpush.bf16.msra.mxu2 %v603_v6  ;;  %s893_s24 = scalar_lea.hbm %s892_s22, 32  ;;  %s897_s27 = scalar_lea.hbm %s1123_s2, 64 }
  0x49   : > { %429 = vmatpush.bf16.msra.mxu3 %v667_v10  ;;  %p894_p1 = scmp.ne.s32.totalorder %s892_s22, %s893_s24  ;;  %p898_p11 = scmp.lt.s32.totalorder %s892_s22, %s1123_s2 }
  0x4a   : > { %388 = vmatpush.bf16.msra.mxu0 %v591_v16  ;;  %p899_p9 = scmp.lt.s32.totalorder %s897_s27, %s893_s24 }
  0x4b   : > { %402 = vmatpush.bf16.msra.mxu1 %v655_v17  ;;  %p895_p4 = pnand %p894_p1, %p1038_p7 }
  0x4c   : > { %416 = vmatpush.bf16.msra.mxu2 %v595_v18  ;;  %p900_p2 = por %p899_p9, %p898_p11 }
  0x4d   : > { %430 = vmatpush.bf16.msra.mxu3 %v659_v22  ;;  %p896_p8 = pneg %p895_p4 }
  0x4e   : > { %389 = vmatpush.bf16.msra.mxu0 %v583_v28 }
  0x4f   : > { %403 = vmatpush.bf16.msra.mxu1 %v647_v31  ;;  %p901_p10 = pnand %p900_p2, %p896_p8 }
  0x50   : > { %417 = vmatpush.bf16.msra.mxu2 %v587_v32 }
  0x51   : > { %431 = vmatpush.bf16.msra.mxu3 %v651_v35  ;;  %390 = vmatmul.bf16.vlgmr.msra.gmra.mxu0 %v188_v36 }
  0x52   : > { %404 = vmatmul.bf16.vlgmr.msra.gmra.mxu1 %v189_v37 }
  0x53   : > { %418 = vmatmul.bf16.vlgmr.msra.gmra.mxu2 %v188_v36 }
  0x54   : > { %432 = vmatmul.bf16.vlgmr.msra.gmra.mxu3 %v189_v37 }
  0xce   : > { %v391_v38 = vpop.f32.mrf.mxu0 }
  0xcf   : > { %v405_v39 = vpop.f32.mrf.mxu1 }
  0xd0   : > { %v406_v40 = vadd.f32 %v405_v39, %v391_v38 }
  0xd6   : > { %v419_v41 = vpop.f32.mrf.mxu2  ;;  %v393_v46 = vpop.f32.mrf.mxu0 }
  0xd7   : > { %v433_v42 = vpop.f32.mrf.mxu3  ;;  %v407_v47 = vpop.f32.mrf.mxu1 }
  0xd8   : > { %v434_v43 = vadd.f32 %v433_v42, %v419_v41  ;;  %v408_v50 = vadd.f32 %v407_v47, %v393_v46 }
  0xda   : > { %v444_v44 = vmax.f32 %v406_v40, %v434_v43  ;;  %v438_v45 = vmin.f32 %v406_v40, %v434_v43 }
  0xdc   : > { %445 = vmax.xlane.f32.xlu1 %v444_v44  ;;  %439 = vmin.xlane.f32.xlu0 %v438_v45 }
  0xde   : > { %v421_v48 = vpop.f32.mrf.mxu2 }
  0xdf   : > { %v435_v49 = vpop.f32.mrf.mxu3 }
  0xe0   : > { %v436_v51 = vadd.f32 %v435_v49, %v421_v48 }
  0xe2   : > { %v447_v52 = vmax.f32 %v408_v50, %v436_v51  ;;  %v441_v53 = vmin.f32 %v408_v50, %v436_v51 }
  0xe4   : > { %448 = vmax.xlane.f32.xlu1 %v447_v52  ;;  %442 = vmin.xlane.f32.xlu0 %v441_v53 }
 0x14f   : > { %v446_v54 = vpop.xlane.xlu1 %445  ;;  %v440_v55 = vpop.xlane.xlu0 %439 }
 0x150   : > { %v450_v56 = vsub.f32 %v446_v54, %v440_v55  ;;  %v456_v61 = vsub.f32 %v406_v40, %v440_v55  ;;  %v457_v62 = vsub.f32 %v434_v43, %v440_v55 }
 0x152   : > { %v452_v57 = vadd.f32 1e-08, %v450_v56 }
 0x154   : > { %813 = vrcp.f32 %v452_v57 }
 0x157   : > { %v449_v58 = vpop.xlane.xlu1 %448  ;;  %v443_v59 = vpop.xlane.xlu0 %442 }
 0x158   : > { %v451_v60 = vsub.f32 %v449_v58, %v443_v59  ;;  %v458_v3 = vsub.f32 %v408_v50, %v443_v59  ;;  %v459_v4 = vsub.f32 %v436_v51, %v443_v59 }
 0x15a   : > { %v814_v63 = vpop.eup %813  ;;  %v453_v0 = vadd.f32 1e-08, %v451_v60 }
 0x15b   : > { %v460_v1 = vmul.f32 %v814_v63, %v456_v61  ;;  %v461_v2 = vmul.f32 %v814_v63, %v457_v62 }
 0x15c   : > { %815 = vrcp.f32 %v453_v0 }
 0x15d   : > { %464 = vst [vmem:[%s181_s20] sm:$0xff] %v460_v1 }
 0x15e   : > { %465 = vst [vmem:[%s181_s20 + $0x8] sm:$0xff] %v461_v2 }
 0x162   : > { %v816_v5 = vpop.eup %815 }
 0x163   : > { %v462_v6 = vmul.f32 %v816_v5, %v458_v3  ;;  %v463_v7 = vmul.f32 %v816_v5, %v459_v4 }
 0x165   : > { %466 = vst [vmem:[%s181_s20 + $0x10] sm:$0xff] %v462_v6 }
 0x166   : > { %467 = vst [vmem:[%s181_s20 + $0x18] sm:$0xff] %v463_v7 }
 0x167   : > { %904 = shalt.err (!%p901_p10)
}
 0x168   : > { %s954_s4 = smov 256   ;;  %s955_s5 = smov 16  }
 0x169   : > { %756 = dma.vmem_to_hbm [thread:$0]  (%p1038_p7), %s483_s19, 512, %s485_s21, %s469_s13, %s954_s4, %s954_s4, %s955_s5  }
 0x16a PF: > { %s499_s6 = sand.u32 1, %s935_s9   ;;  %p1129_p12 = scmp.ge.s32.totalorder %s947_s12, 2 }
 0x16b   : > { %s500_s7 = scalar_lea.sflag [#allocation4], %s499_s6 }
 0x16c   : > { %p767_p13 = pnand %p1129_p12, %p1006_p6 }
 0x16e   : > { %p768_p0 = pneg %p767_p13 }
 0x170   : > { %930 = dma.done.wait (%p768_p0), %s500_s7, 512  }
 0x171   : > { %932 = vsyncadd (%p768_p0), %s500_s7, 4294966784  ;;  %p16_p3 = scmp.ge.s32.totalorder %s1024_s23, 4   ;;  %s1130_s9 = smov %s939_s10 }
 0x172   : > { %s1131_s10 = smov %s943_s11  ;;  %s1132_s11 = smov %s1034_s28 }
 0x173   : > { %s1133_s12 = smov %s1024_s23  ;;  %18 = sbr.rel (!%p16_p3) target bundleno = 6 (0x6), region = 77 }
 0x178   :  { %506 = vsyncpa [#allocation3], 1 }
 0x179   :  { %508 = vsyncpa [#allocation3 + $0x1], 1 }
 0x17a   :  { %509 = vsyncpa [#allocation6], 1 }
 0x17b   :  { %510 = vsyncpa [#allocation4], 1 }
 0x17c   :  { %512 = vsyncpa [#allocation4 + $0x1], 1 }

</bundles_post_ra>
